<compile_context>
chip_gen: v6e
topology: v6e:2x2x1
jax: 0.10.0
libtpu: 0.0.40
codegen_flags: <defaults>
</compile_context>

<pallas_src>
import functools

import jax
import jax.numpy as jnp
from jax.experimental import pallas as pl
from jax.experimental.pallas import tpu as pltpu


# ---------------------------------------------------------------------------
# Kernels
# ---------------------------------------------------------------------------
def _laplace_kernel_flat(x_ref, o_ref, *, h, w):
    """Small-W path. Block: x (NB, 1, H*W), o (NB, 2, H*W). Lane-dense last dim."""
    x = x_ref[...]                                   # (NB, 1, H*W) f32
    hw = h * w
    col = jax.lax.broadcasted_iota(jnp.int32, x.shape, 2)   # flat pixel index
    wi = col % w                                     # width index within each row

    c2 = -2.0 * x                                    # shared by both channels

    # Horizontal neighbours: lane rolls by +-1 (mod HW), zero at w==0 / w==W-1.
    left  = jnp.where(wi > 0,     pltpu.roll(x, 1,      axis=2), 0.0)
    right = jnp.where(wi < w - 1, pltpu.roll(x, hw - 1, axis=2), 0.0)
    # Vertical neighbours: lane rolls by +-W (mod HW), zero at h==0 / h==H-1.
    up    = jnp.where(col >= w,          pltpu.roll(x, w,      axis=2), 0.0)
    down  = jnp.where(col < (h - 1) * w, pltpu.roll(x, hw - w, axis=2), 0.0)

    o_ref[:, 0:1] = left + right + c2                # edge_kx: d2/dx2 (width)
    o_ref[:, 1:2] = up + down + c2                   # edge_ky: d2/dy2 (height)


def _laplace_kernel_spatial(x_ref, o_ref):
    """Wide-W path. Block: x (NB, 1, H, W), o (NB, 2, H, W)."""
    x = x_ref[...]                                   # (NB, 1, H, W) f32
    h, w = x.shape[2], x.shape[3]
    row = jax.lax.broadcasted_iota(jnp.int32, x.shape, 2)
    col = jax.lax.broadcasted_iota(jnp.int32, x.shape, 3)

    c2 = -2.0 * x                                    # shared by both channels

    left  = jnp.where(col > 0,     pltpu.roll(x, 1,     axis=3), 0.0)
    right = jnp.where(col < w - 1, pltpu.roll(x, w - 1, axis=3), 0.0)
    up    = jnp.where(row > 0,     pltpu.roll(x, 1,     axis=2), 0.0)
    down  = jnp.where(row < h - 1, pltpu.roll(x, h - 1, axis=2), 0.0)

    o_ref[:, 0:1] = left + right + c2                # edge_kx
    o_ref[:, 1:2] = up + down + c2                   # edge_ky


# ---------------------------------------------------------------------------
# Wrapper
# ---------------------------------------------------------------------------
def _round_up(a, b):
    return (a + b - 1) // b * b


def _vmem_capacity_bytes():
    try:
        return int(pltpu.get_tpu_info().vmem_capacity_bytes)
    except Exception:
        return 64 * 1024 * 1024   # conservative (v7x per-core VMEM)


def _pick_batch_block(n, per_image_bytes, vmem_bytes):
    """Images per grid step: big enough to amortize per-step overhead, small
    enough to double-buffer comfortably, and >=2 grid points when possible."""
    budget = min(vmem_bytes // 4, 32 * 1024 * 1024)
    nb = max(1, min(n, budget // max(per_image_bytes, 1)))
    if n >= 2:
        nb = max(1, min(nb, n // 2))   # keep >=2 grid steps for v7x megacore
    while n % nb:                      # full blocks only (nb divides n)
        nb -= 1
    return nb


def laplace(x):
    """x: (N, 1, H, W) -> (N, 2, H, W), matching the torch Laplace module."""
    n, c, h, w = x.shape
    assert c == 1, "Laplace expects single-channel input (Conv2d(1, 2, ...))"
    x = x.astype(jnp.float32)

    vmem = _vmem_capacity_bytes()
    cparams = pltpu.CompilerParams(
        dimension_semantics=("parallel",),
        vmem_limit_bytes=int(min(vmem // 2, 64 * 1024 * 1024)),
    )

    if w < 128:
        # Flattened, lane-dense layout: last dim H*W (>=128 for realistic images).
        hwp = _round_up(h * w, 128)
        per_image = 4 * 8 * hwp * 2 * 2 * 2   # f32 * sublane pad * (in/out) * dbl-buf * margin
        nb = _pick_batch_block(n, per_image, vmem)
        out = pl.pallas_call(
            functools.partial(_laplace_kernel_flat, h=h, w=w),
            out_shape=jax.ShapeDtypeStruct((n, 2, h * w), jnp.float32),
            grid=(n // nb,),
            in_specs=[pl.BlockSpec((nb, 1, h * w), lambda i: (i, 0, 0))],
            out_specs=pl.BlockSpec((nb, 2, h * w), lambda i: (i, 0, 0)),
            compiler_params=cparams,
        )(x.reshape(n, 1, h * w))
    else:
        per_image = 4 * _round_up(h, 8) * _round_up(w, 128) * 3 * 2 * 2
        nb = _pick_batch_block(n, per_image, vmem)
        out = pl.pallas_call(
            _laplace_kernel_spatial,
            out_shape=jax.ShapeDtypeStruct((n, 2, h, w), jnp.float32),
            grid=(n // nb,),
            in_specs=[pl.BlockSpec((nb, 1, h, w), lambda i: (i, 0, 0, 0))],
            out_specs=pl.BlockSpec((nb, 2, h, w), lambda i: (i, 0, 0, 0)),
            compiler_params=cparams,
        )(x)

    # PyTorch: out.contiguous().view(-1, 2, H, W) -- identity reshape here.
    return out.reshape(-1, 2, h, w)


# ---------------------------------------------------------------------------
# Pure-JAX reference (matches the fixed-weight torch Conv2d)
# ---------------------------------------------------------------------------
def _laplace_ref(x):
    edge_kx = jnp.array([[0, 0, 0], [1, -2, 1], [0, 0, 0]], dtype=jnp.float32)
    edge_ky = jnp.array([[0, 1, 0], [0, -2, 0], [0, 1, 0]], dtype=jnp.float32)
    wgt = jnp.stack([edge_kx, edge_ky])[:, None, :, :]      # (2, 1, 3, 3) OIHW
    return jax.lax.conv_general_dilated(
        x.astype(jnp.float32), wgt, window_strides=(1, 1),
        padding=((1, 1), (1, 1)),
        dimension_numbers=("NCHW", "OIHW", "NCHW"))


if __name__ == "__main__":
    key = jax.random.PRNGKey(0)
    k1, k2 = jax.random.split(key)

    # Small-W regime (matches the torch harness shape): flattened lane-dense path.
    x = jax.random.normal(k1, (2, 1, 16, 16), dtype=jnp.float32)
    out = jax.block_until_ready(laplace(x))
    assert out.shape == (2, 2, 16, 16), out.shape
    assert jnp.allclose(out, _laplace_ref(x), atol=1e-5, rtol=1e-5), \
        "mismatch vs conv reference (flat path)"

    # Wide-W regime: spatial roll+mask path (W >= 128).
    x2 = jax.random.normal(k2, (2, 1, 8, 128), dtype=jnp.float32)
    out2 = jax.block_until_ready(laplace(x2))
    assert out2.shape == (2, 2, 8, 128), out2.shape
    assert jnp.allclose(out2, _laplace_ref(x2), atol=1e-5, rtol=1e-5), \
        "mismatch vs conv reference (spatial path)"

    print("KERNEL_OK")
</pallas_src>

<mosaic_0001>
module attributes {stable_mosaic.version = 11 : i64} {
  func.func @_laplace_kernel_flat(%arg0: i32, %arg1: memref<1x1x256xf32, #tpu.memory_space<vmem>>, %arg2: memref<1x2x256xf32, #tpu.memory_space<vmem>>) attributes {dimension_semantics = [#tpu.dimension_semantics<parallel>], iteration_bounds = array<i64: 2>, scalar_prefetch = 0 : i64, scratch_operands = 0 : i64, tpu.core_type = #tpu.core_type<tc>, window_params = [{transform_indices = @transform_0, window_bounds = array<i64: 1, 1, 256>}, {transform_indices = @transform_1, window_bounds = array<i64: 1, 2, 256>}]} {
    %c0 = arith.constant 0 : index
    %c0_0 = arith.constant 0 : index
    %c0_1 = arith.constant 0 : index
    %0 = vector.load %arg1[%c0, %c0_0, %c0_1] : memref<1x1x256xf32, #tpu.memory_space<vmem>>, vector<1x1x256xf32>
    %1 = tpu.iota {dimensions = array<i32: 2>} : vector<1x1x256xi32>
    %c16_i32 = arith.constant 16 : i32
    %c0_i32 = arith.constant 0 : i32
    %2 = arith.cmpi eq, %c16_i32, %c0_i32 : i32
    %c1_i32 = arith.constant 1 : i32
    %3 = arith.select %2, %c1_i32, %c16_i32 : i32
    %4 = vector.broadcast %3 : i32 to vector<1x1x256xi32>
    %5 = arith.remsi %1, %4 : vector<1x1x256xi32>
    %c0_i32_2 = arith.constant 0 : i32
    %6 = vector.broadcast %c0_i32_2 : i32 to vector<1x1x256xi32>
    %7 = arith.cmpi ne, %5, %6 : vector<1x1x256xi32>
    %c0_i32_3 = arith.constant 0 : i32
    %8 = vector.broadcast %c0_i32_3 : i32 to vector<1x1x256xi32>
    %9 = arith.cmpi slt, %5, %8 : vector<1x1x256xi32>
    %c0_i32_4 = arith.constant 0 : i32
    %10 = arith.cmpi slt, %3, %c0_i32_4 : i32
    %11 = vector.broadcast %10 : i1 to vector<1x1x256xi1>
    %12 = vector.broadcast %11 : vector<1x1x256xi1> to vector<1x1x256xi1>
    %13 = arith.xori %9, %12 : vector<1x1x256xi1>
    %14 = arith.andi %13, %7 : vector<1x1x256xi1>
    %15 = vector.broadcast %3 : i32 to vector<1x1x256xi32>
    %16 = arith.addi %5, %15 : vector<1x1x256xi32>
    %17 = arith.select %14, %16, %5 : vector<1x1x256xi1>, vector<1x1x256xi32>
    %cst = arith.constant -2.000000e+00 : f32
    %18 = vector.broadcast %cst : f32 to vector<1x1x256xf32>
    %19 = arith.mulf %18, %0 : vector<1x1x256xf32>
    %c0_i32_5 = arith.constant 0 : i32
    %20 = vector.broadcast %c0_i32_5 : i32 to vector<1x1x256xi32>
    %21 = arith.cmpi sgt, %17, %20 : vector<1x1x256xi32>
    %c1_i32_6 = arith.constant 1 : i32
    %22 = tpu.dynamic_rotate %0 by %c1_i32_6 dim 2 : vector<1x1x256xf32>, i32 -> vector<1x1x256xf32>
    %cst_7 = arith.constant 0.000000e+00 : f32
    %23 = vector.broadcast %cst_7 : f32 to vector<1x1x256xf32>
    %24 = arith.select %21, %22, %23 : vector<1x1x256xi1>, vector<1x1x256xf32>
    %c15_i32 = arith.constant 15 : i32
    %25 = vector.broadcast %c15_i32 : i32 to vector<1x1x256xi32>
    %26 = arith.cmpi slt, %17, %25 : vector<1x1x256xi32>
    %c255_i32 = arith.constant 255 : i32
    %27 = tpu.dynamic_rotate %0 by %c255_i32 dim 2 : vector<1x1x256xf32>, i32 -> vector<1x1x256xf32>
    %cst_8 = arith.constant 0.000000e+00 : f32
    %28 = vector.broadcast %cst_8 : f32 to vector<1x1x256xf32>
    %29 = arith.select %26, %27, %28 : vector<1x1x256xi1>, vector<1x1x256xf32>
    %c16_i32_9 = arith.constant 16 : i32
    %30 = vector.broadcast %c16_i32_9 : i32 to vector<1x1x256xi32>
    %31 = arith.cmpi sge, %1, %30 : vector<1x1x256xi32>
    %c16_i32_10 = arith.constant 16 : i32
    %32 = tpu.dynamic_rotate %0 by %c16_i32_10 dim 2 : vector<1x1x256xf32>, i32 -> vector<1x1x256xf32>
    %cst_11 = arith.constant 0.000000e+00 : f32
    %33 = vector.broadcast %cst_11 : f32 to vector<1x1x256xf32>
    %34 = arith.select %31, %32, %33 : vector<1x1x256xi1>, vector<1x1x256xf32>
    %c240_i32 = arith.constant 240 : i32
    %35 = vector.broadcast %c240_i32 : i32 to vector<1x1x256xi32>
    %36 = arith.cmpi slt, %1, %35 : vector<1x1x256xi32>
    %c240_i32_12 = arith.constant 240 : i32
    %37 = tpu.dynamic_rotate %0 by %c240_i32_12 dim 2 : vector<1x1x256xf32>, i32 -> vector<1x1x256xf32>
    %cst_13 = arith.constant 0.000000e+00 : f32
    %38 = vector.broadcast %cst_13 : f32 to vector<1x1x256xf32>
    %39 = arith.select %36, %37, %38 : vector<1x1x256xi1>, vector<1x1x256xf32>
    %40 = arith.addf %24, %29 : vector<1x1x256xf32>
    %41 = arith.addf %40, %19 : vector<1x1x256xf32>
    %c0_14 = arith.constant 0 : index
    %c0_15 = arith.constant 0 : index
    %c0_16 = arith.constant 0 : index
    %42 = vector.load %arg2[%c0_14, %c0_15, %c0_16] : memref<1x2x256xf32, #tpu.memory_space<vmem>>, vector<1x1x256xf32>
    tpu.vector_store %arg2[%c0_14, %c0_15, %c0_16], %41 {strides = array<i32>} : memref<1x2x256xf32, #tpu.memory_space<vmem>>, vector<1x1x256xf32>,
    %43 = arith.addf %34, %39 : vector<1x1x256xf32>
    %44 = arith.addf %43, %19 : vector<1x1x256xf32>
    %c0_17 = arith.constant 0 : index
    %c1 = arith.constant 1 : index
    %c0_18 = arith.constant 0 : index
    %45 = vector.load %arg2[%c0_17, %c1, %c0_18] : memref<1x2x256xf32, #tpu.memory_space<vmem>>, vector<1x1x256xf32>
    tpu.vector_store %arg2[%c0_17, %c1, %c0_18], %44 {strides = array<i32>} : memref<1x2x256xf32, #tpu.memory_space<vmem>>, vector<1x1x256xf32>,
    return
  }
  func.func @transform_0(%arg0: i32) -> (i32, i32, i32) {
    %c0_i32 = arith.constant 0 : i32
    %c0_i32_0 = arith.constant 0 : i32
    %c0_i32_1 = arith.constant 0 : i32
    return %arg0, %c0_i32, %c0_i32_0 : i32, i32, i32
  }
  func.func @transform_1(%arg0: i32) -> (i32, i32, i32) {
    %c0_i32 = arith.constant 0 : i32
    %c0_i32_0 = arith.constant 0 : i32
    %c0_i32_1 = arith.constant 0 : i32
    return %arg0, %c0_i32, %c0_i32_0 : i32, i32, i32
  }
}

</mosaic_0001>

<bundles_post_ra>
// kernel: tpu_custom_call.1
= control target key start
LH: loop header
LB: loop body
LE: loop exit
PB: predicated region body
PF: predicated region fallthrough
CT: control target
= control target key end

     0   :  { %6 = vsyncpa [#allocation3], 0  ;;  %s690_s0 = inlined_call_operand.hbm [shape: f32[2,1,256], index: 0, kind: input, shape index: {}]   ;;  %s691_s1 = inlined_call_operand.hbm [shape: f32[2,2,256], index: 1, kind: output, shape index: {}]  }
   0x1   :  { %8 = vsyncpa [#allocation3 + $0x1], 0 }
   0x2   :  { %9 = vsyncpa [#allocation4], 0 }
   0x3   :  { %11 = vsyncpa [#allocation4 + $0x1], 0  ;;  %s543_s6 = smov 0   ;;  %s545_s7 = smov 0  }
   0x4   :  { %s547_s8 = smov 0   ;;  %s549_s9 = smov 0  }
   0x5 LB: > { %s564_s10 = sadd.s32 4294967295, %s524_s9   ;;  %s364_s11 = sadd.s32 4294967294, %s524_s9   ;;  %s524_s9 = sphi %s549_s9, %s708_s9   ;;  %s520_s8 = sphi %s547_s8, %s707_s8   ;;  %s516_s7 = sphi %s545_s7, %s706_s7   ;;  %s512_s6 = sphi %s543_s6, %s705_s6  }
   0x6   : > { %s568_s12 = sadd.s32 1, %s524_s9   ;;  %s24_s13 = sadd.s32 1, %s520_s8 }
   0x7   : > { %s21_s14 = ssub.s32 %s524_s9, %s568_s12  ;;  %p31_p0 = scmp.ne.s32.totalorder %s520_s8, %s516_s7 }
   0x8   : > { %p22_p1 = scmp.eq.s32.totalorder %s21_s14, 0  ;;  %p32_p2 = scmp.eq.s32.totalorder %s524_s9, 0 }
   0x9   : > { %p37_p3 = scmp.ne.s32.totalorder %s516_s7, %s512_s6  ;;  %p38_p4 = scmp.eq.s32.totalorder %s564_s10, 0 }
   0xa   : > { %s580_s15 = scalar_select %p22_p1, %s520_s8, %s24_s13  }
   0xb   : > { %p582_p5 = por %p32_p2, %p31_p0  ;;  %p586_p6 = por %p38_p4, %p37_p3 }
   0xc   : > { %p61_p7 = scmp.eq.s32.totalorder %s564_s10, 1  ;;  %p67_p8 = scmp.eq.s32.totalorder %s364_s11, 1 }
   0xd   : > { %s695_s17 = scalar_select %p586_p6, 1, 0 }
   0xe   : > { %p393_p10 = scmp.lt.s32.totalorder %s524_s9, 2  ;;  %p593_p11 = por %p61_p7, %p31_p0 }
   0xf   : > { %p597_p12 = por %p67_p8, %p37_p3  ;;  %s87_s20 = sand.u32 1, %s520_s8  }
  0x10   : > { %s696_s18 = scalar_select %p593_p11, 1, 0 }
  0x11   : > { %s697_s19 = scalar_select %p597_p12, 1, 0 }
  0x12   : > { %s379_s21 = sshll.u32 %s524_s9, 5  ;;  %s367_s22 = sshll.u32 %s87_s20, 1 }
  0x13   : > { %s606_s25 = scalar_lea.hbm %s690_s0, %s379_s21  ;;  %s91_s26 = scalar_lea.vmem [#allocation2], %s367_s22 }
  0x14   : > { %s99_s27 = sshll.u32 %s91_s26, 4  ;;  %p610_p13 = pnand %p393_p10, %p582_p5  ;;  %s614_s27 = int_to_ptr.vmem [resolvable:$true] %s99_s27 }
  0x15   : > { %s88_s29 = scalar_lea.sflag [#allocation3], %s87_s20  ;;  %s432_s30 = scalar_lea.hbm %s606_s25, 32 }
  0x16   : > { %p433_p2 = scmp.ne.s32.totalorder %s606_s25, %s432_s30  ;;  %p434_p3 = pneg %p610_p13 }
  0x17   : > { %s437_s4 = scalar_lea.hbm %s690_s0, 64  ;;  %p438_p5 = scmp.lt.s32.totalorder %s606_s25, %s690_s0 }
  0x18   : > { %p435_p4 = pnand %p434_p3, %p433_p2  ;;  %p439_p8 = scmp.lt.s32.totalorder %s437_s4, %s432_s30 }
  0x1a   : > { %p436_p7 = pneg %p435_p4  ;;  %p440_p10 = por %p439_p8, %p438_p5 }
  0x1c   : > { %p441_p9 = pnand %p440_p10, %p436_p7 }
  0x1e   : > { %444 = shalt.err (!%p441_p9)
}
  0x1f   : > { %s445_s13 = scalar_lea.vmem %s614_s27, 32  ;;  %s526_s14 = smov [#allocation2]  }
  0x20   : > { %p446_p0 = scmp.ne.s32.totalorder %s614_s27, %s445_s13  ;;  %s450_s16 = sshll.u32 %s526_s14, 4  ;;  %s451_s16 = int_to_ptr.vmem [resolvable:$false] %s450_s16 }
  0x21   : > { %s452_s20 = scalar_lea.vmem %s451_s16, 64  ;;  %p453_p4 = scmp.lt.s32.totalorder %s614_s27, %s451_s16 }
  0x22   : > { %p448_p1 = pnand %p446_p0, %p434_p3  ;;  %p454_p12 = scmp.lt.s32.totalorder %s452_s20, %s445_s13 }
  0x24   : > { %p449_p2 = pneg %p448_p1  ;;  %p455_p11 = por %p454_p12, %p453_p4 }
  0x26   : > { %p456_p6 = pnand %p455_p11, %p449_p2 }
  0x28   : > { %459 = shalt.err (!%p456_p6)
}
  0x29   : > { %388 = dma.hbm_to_vmem [thread:$0]  (!%p610_p13), %s606_s25, 32, %s614_s27, %s88_s29  }
  0x2a   : > { %p699_p9 = scmp.lt.s32.totalorder %s524_s9, 3  ;;  %p700_p7 = scmp.ge.s32.totalorder %s524_s9, 1 }
  0x2c   : > { %p105_p0 = pnand %p700_p7, %p699_p9 }
  0x2d   : > { %s641_s21 = sand.u32 (!%p105_p0), 1, %s516_s7   ;;  %p701_p6 = scmp.ne.s32.totalorder (!%p105_p0), %s695_s17, 0 }
  0x2e   : > { %108 = sbr.rel (%p105_p0) target bundleno = 212 (0xd4), region = 24  ;;  %s371_s22 = sshll.u32 (!%p105_p0), %s641_s21, 1 }
  0x2f   : > { %s111_s23 = scalar_lea.sflag (!%p105_p0), [#allocation3], %s641_s21  ;;  %s114_s24 = scalar_lea.vmem (!%p105_p0), [#allocation2], %s371_s22 }
  0x33   : > { %503 = dma.done.wait (%p701_p6), %s111_s23, 32  }
  0x34   : > { %505 = vsyncadd (%p701_p6), %s111_s23, 4294967264  ;;  %v134_v0 = vlaneseq  ;;  %v133_v4 = vld [vmem:[%s114_s24] sm:$0x3]  ;;  %s527_s25 = smov 127   ;;  %s528_s26 = smov 1  }
  0x35   : > { %v161_v6 = vmul.f32 -2.0, %v133_v4  ;;  %s529_s27 = smov 16   ;;  %s530_s17 = smov 112   ;;  %v531_v16 = vmov 1966171168  }
  0x36   : > { %v166_v1 = vshrl.u32 %v134_v0, 7  ;;  %v135_v10 = vand.u32 127, %v134_v0  ;;  %v236_v17 = vunpack.c.l.s4 %v531_v16  ;;  %s372_s28 = sshll.u32 %s641_s21, 2  ;;  %vm252_vm10 = vcmp.lt.s32.totalorder %v134_v0, 256  ;;  %s380_s30 = sshll.u32 %s564_s10, 6 }
  0x37   : > { %s132_s29 = scalar_lea.vmem [#allocation5], %s372_s28  ;;  %s292_s5 = scalar_lea.hbm %s691_s1, %s380_s30 }
  0x38   : > { %v167_v2 = vsub.s32 0, %v166_v1  ;;  %v171_v3 = vsub.s32 1, %v166_v1  ;;  %v136_v11 = vadd.s32 128, %v135_v10  ;;  %v141_v12 = vand.u32 15, %v135_v10  ;;  %s294_s2 = sshll.u32 %s132_s29, 4  ;;  %s280_s11 = scalar_lea.sflag [#allocation4], %s641_s21  ;;  %s295_s2 = int_to_ptr.vmem [resolvable:$true] %s294_s2 }
  0x39   : > { %vm190_vm0 = vcmp.lt.s32.totalorder %v135_v10, 127  ;;  %vm179_vm1 = vcmp.lt.s32.totalorder %v135_v10, 1  ;;  %v237_v19 = vunpack.c.0.s8 %v236_v17  ;;  %vm201_vm6 = vcmp.lt.s32.totalorder %v135_v10, 16  ;;  %s460_s13 = scalar_lea.vmem %s295_s2, 64  ;;  %p702_p12 = scmp.ne.s32.totalorder %s696_s18, 0 }
  0x3a   : > { %v168_v5 = vrot.slane %v133_v4, %v167_v2  ;;  %v172_v7 = vrot.slane %v133_v4, %v171_v3  ;;  %v223_v8 = vrot.slane %v161_v6, %v167_v2  ;;  %v227_v9 = vrot.slane %v161_v6, %v171_v3  ;;  %p461_p11 = scmp.ne.s32.totalorder %s295_s2, %s460_s13  ;;  %s532_s14 = smov [#allocation5]  }
  0x3b   : > { %v148_v13 = vand.u32 15, %v136_v11  ;;  %vm184_vm2 = vcmp.lt.s32.totalorder %v141_v12, 15  ;;  %vm162_vm4 = vcmp.gt.s32.totalorder %v141_v12, 0  ;;  %v240_v33 = vsub.s32 %v237_v19, %v166_v1  ;;  %s464_s16 = sshll.u32 %s532_s14, 4  ;;  %s465_s16 = int_to_ptr.vmem [resolvable:$false] %s464_s16 }
  0x3c   : > { %186 = vrot.lane.b32.xlu1 %v168_v5, %s527_s25  ;;  %175 = vrot.lane.b32.xlu0 %v168_v5, %s528_s26  ;;  %vm195_vm7 = vcmp.ge.s32.totalorder %v135_v10, 16  ;;  %vm212_vm8 = vcmp.lt.s32.totalorder %v135_v10, 112  ;;  %vm207_vm9 = vcmp.lt.s32.totalorder %v136_v11, 240  ;;  %p462_p13 = pnand %p461_p11, %p702_p12  ;;  %s466_s20 = scalar_lea.vmem %s465_s16, 128 }
  0x3d   : > { %vm185_vm3 = vcmp.lt.s32.totalorder %v148_v13, 15  ;;  %vm163_vm5 = vcmp.gt.s32.totalorder %v148_v13, 0  ;;  %p467_p3 = scmp.lt.s32.totalorder %s295_s2, %s465_s16  ;;  %p468_p5 = scmp.lt.s32.totalorder %s466_s20, %s460_s13 }
  0x3e   : > { %p463_p1 = pneg %p462_p13 }
  0x3f   : > { %p469_p8 = por %p468_p5, %p467_p3 }
  0x40   : > { %188 = vrot.lane.b32.xlu1 %v172_v7, %s527_s25  ;;  %177 = vrot.lane.b32.xlu0 %v172_v7, %s528_s26 }
  0x41   : > { %p470_p10 = pnand %p469_p8, %p463_p1 }
  0x44   : > { %199 = vrot.lane.b32.xlu1 %v172_v7, %s529_s27  ;;  %197 = vrot.lane.b32.xlu0 %v168_v5, %s529_s27 }
  0x48   : > { %210 = vrot.lane.b32.xlu1 %v172_v7, %s530_s17  ;;  %208 = vrot.lane.b32.xlu0 %v168_v5, %s530_s17 }
  0xae   : > { %v187_v14 = vpop.permute.xlu1 %186  ;;  %v176_v15 = vpop.permute.xlu0 %175 }
  0xb2   : > { %v189_v18 = vpop.permute.xlu1 %188  ;;  %v178_v20 = vpop.permute.xlu0 %177 }
  0xb3   : > { %v191_v21 = vsel %vm190_vm0, %v187_v14, %v189_v18  ;;  %v192_v22 = vsel %vm190_vm0, %v189_v18, %v187_v14  ;;  %v180_v23 = vsel %vm179_vm1, %v176_v15, %v178_v20  ;;  %v181_v24 = vsel %vm179_vm1, %v178_v20, %v176_v15 }
  0xb4   : > { %v193_v25 = vsel %vm184_vm2, %v191_v21, 0.0  ;;  %v194_v26 = vsel %vm185_vm3, %v192_v22, 0.0  ;;  %v182_v27 = vsel %vm162_vm4, %v181_v24, 0.0  ;;  %v183_v28 = vsel %vm163_vm5, %v180_v23, 0.0 }
  0xb5   : > { %v217_v29 = vadd.f32 %v193_v25, %v182_v27  ;;  %v218_v30 = vadd.f32 %v194_v26, %v183_v28 }
  0xb6   : > { %v200_v31 = vpop.permute.xlu1 %199  ;;  %v198_v32 = vpop.permute.xlu0 %197 }
  0xb7   : > { %v230_v34 = vadd.f32 %v223_v8, %v217_v29  ;;  %v231_v35 = vadd.f32 %v227_v9, %v218_v30  ;;  %v203_v36 = vsel %vm201_vm6, %v200_v31, %v198_v32  ;;  %v202_v44 = vsel %vm201_vm6, %v198_v32, %v200_v31 }
  0xb8   : > { %v204_v41 = vsel %vm195_vm7, %v203_v36, 0.0 }
  0xb9   : > { %v234_v37 = vcombine.low %v230_v34, %v231_v35 }
  0xba   : > { %v211_v38 = vpop.permute.xlu1 %210  ;;  %v209_v39 = vpop.permute.xlu0 %208 }
  0xbb   : > { %v241_v40 = vrot.slane %v234_v37, %v240_v33  ;;  %v213_v42 = vsel %vm212_vm8, %v209_v39, %v211_v38  ;;  %v214_v43 = vsel %vm212_vm8, %v211_v38, %v209_v39 }
  0xbc   : > { %v216_v45 = vsel %vm207_vm9, %v214_v43, 0.0  ;;  %v255_v46 = vadd.f32 %v213_v42, %v204_v41 }
  0xbd   : > { %v248_v47 = vrot.slane %v241_v40, %v240_v33  ;;  %v256_v48 = vadd.f32 %v216_v45, %v202_v44 }
  0xbe   : > { %v257_v49 = vadd.f32 %v255_v46, %v223_v8 }
  0xbf   : > { %v258_v50 = vadd.f32 %v256_v48, %v227_v9  ;;  %254 = vst.msk [vmem:[%s132_s29] ss:$2 sm:$0x3] %vm252_vm10, %v248_v47 }
  0xc1   : > { %v261_v51 = vcombine.low %v257_v49, %v258_v50 }
  0xc3   : > { %v268_v52 = vrot.slane %v261_v51, %v240_v33 }
  0xc5   : > { %v275_v53 = vrot.slane %v268_v52, %v240_v33 }
  0xc7   : > { %373 = vst.msk [vmem:[%s132_s29 + $0x1] ss:$2 sm:$0x3] %vm252_vm10, %v275_v53 }
  0xc8   : > { %473 = shalt.err (!%p470_p10)
}
  0xc9   : > { %s474_s10 = scalar_lea.hbm %s292_s5, 64  ;;  %s478_s23 = scalar_lea.hbm %s691_s1, 128 }
  0xca   : > { %p475_p2 = scmp.ne.s32.totalorder %s292_s5, %s474_s10  ;;  %p479_p7 = scmp.lt.s32.totalorder %s292_s5, %s691_s1 }
  0xcb   : > { %p480_p0 = scmp.lt.s32.totalorder %s478_s23, %s474_s10 }
  0xcc   : > { %p476_p4 = pnand %p475_p2, %p702_p12 }
  0xcd   : > { %p481_p6 = por %p480_p0, %p479_p7 }
  0xce   : > { %p477_p9 = pneg %p476_p4 }
  0xd0   : > { %p482_p11 = pnand %p481_p6, %p477_p9 }
  0xd2   : > { %485 = shalt.err (!%p482_p11)
}
  0xd3   : > { %383 = dma.vmem_to_hbm [thread:$0]  (%p702_p12), %s295_s2, 64, %s292_s5, %s280_s11  }
  0xd4 PF: > { %s306_s26 = sand.u32 1, %s512_s6   ;;  %p703_p13 = scmp.ne.s32.totalorder %s697_s19, 0 }
  0xd5   : > { %p704_p1 = scmp.ge.s32.totalorder %s524_s9, 2  ;;  %s307_s27 = scalar_lea.sflag [#allocation4], %s306_s26 }
  0xd7   : > { %p390_p3 = pnand %p704_p1, %p703_p13 }
  0xd9   : > { %p391_p5 = pneg %p390_p3 }
  0xdb   : > { %507 = dma.done.wait (%p391_p5), %s307_s27, 64  }
  0xdc   : > { %509 = vsyncadd (%p391_p5), %s307_s27, 4294967232  ;;  %p14_p8 = scmp.ge.s32.totalorder %s568_s12, 4   ;;  %s705_s6 = smov %s516_s7 }
  0xdd   : > { %s706_s7 = smov %s520_s8  ;;  %s707_s8 = smov %s580_s15 }
  0xde   : > { %s708_s9 = smov %s568_s12  ;;  %16 = sbr.rel (!%p14_p8) target bundleno = 5 (0x5), region = 70 }
  0xe3   :  { %312 = vsyncpa [#allocation3], 1 }
  0xe4   :  { %314 = vsyncpa [#allocation3 + $0x1], 1 }
  0xe5   :  { %315 = vsyncpa [#allocation4], 1 }
  0xe6   :  { %317 = vsyncpa [#allocation4 + $0x1], 1 }

</bundles_post_ra>
